<compile_context>
chip_gen: v5e
topology: v5e:2x2
jax: 0.10.0
libtpu: 0.0.40
codegen_flags: <defaults>
</compile_context>

<pallas_src>
import jax
import jax.numpy as jnp
from jax.experimental import pallas as pl
from jax.experimental.pallas import tpu as pltpu


def attention_kernel(h2_ref, l_ref, ww_t_ref, bw_ref, wv_row_ref,
                     out_ref, w1_ref):
    """One batch tile.

    h2_ref:     (TB*S, H)  streamed, native dtype (h flattened in the wrapper)
    l_ref:      (TB, S, D) streamed, native dtype
    ww_t_ref:   (H, H)     W_w transposed (y = x @ ww_t), grid-resident
    bw_ref:     (1, H)     f32, grid-resident
    wv_row_ref: (1, H)     f32, grid-resident
    out_ref:    (TB, D)
    w1_ref:     (TB, S)
    """
    TB, S, _ = l_ref.shape

    # ---- w = tanh(h @ W_w^T + b_w): MXU matmul (f32 accumulate) + EUP tanh.
    wt = jnp.tanh(
        jnp.dot(h2_ref[...], ww_t_ref[...],
                preferred_element_type=jnp.float32)
        + bw_ref[...]
    )                                                          # (TB*S, H) f32

    # ---- score = <w, v_row> per row: VPU multiply + lane reduce.
    # (No MXU matmul with a single output lane; v_bias dropped because the
    #  softmax below is shift-invariant, so outputs are identical.)
    score = jnp.sum(wt * wv_row_ref[...], axis=-1, keepdims=True)  # (TB*S, 1)

    # ---- softmax over the sequence axis (dim=1, as F.softmax picks).
    # The pivot to the lane-dense (TB, S) layout acts only on this tiny score
    # tensor; the streamed h/l tiles keep their DMA layout.
    score = score.reshape(TB, S)
    m = jnp.max(score, axis=1, keepdims=True)
    e = jnp.exp(score - m)
    inv = pl.reciprocal(jnp.sum(e, axis=1, keepdims=True), approx=False)
    weight = e * inv                                           # (TB, S) f32
    w1_ref[...] = weight.astype(w1_ref.dtype)

    # ---- out[b, d] = sum_s weight[b, s] * l[b, s, d]:
    # VPU broadcast-multiply + sublane reduce (MXU left idle — avoids TB
    # serialized M=1 matmuls through the MXU result FIFO).
    out = jnp.sum(l_ref[...] * weight[:, :, None], axis=1)     # (TB, D) f32
    out_ref[...] = out.astype(out_ref.dtype)


def _vmem_capacity_bytes():
    """Physical VMEM per TensorCore (128 MiB v5e/v6e, 64 MiB v7x)."""
    try:
        cap = getattr(pltpu.get_tpu_info(), "vmem_capacity_bytes", None)
        if cap:
            return int(cap)
    except Exception:
        pass
    return 64 * 1024 * 1024  # conservative fallback (fits v7x)


def _choose_batch_tile(B, S, H, D, in_itemsize, out_itemsize, param_itemsize,
                       vmem_capacity):
    """Batches per grid step, sized to fill (most of) VMEM.

    Tile working-set budget ~75% of physical VMEM; vmem_limit_bytes is raised
    to ~90% so the 8-batch sublane floor below still has headroom for extreme
    S*(H+D).
    """
    budget = int(0.75 * vmem_capacity)

    # Grid-resident operands (constant index_map); Pallas still allocates two
    # buffers each.  Bias / v-row blocks are tiny but padded to (8, >=128).
    fixed = 2 * param_itemsize * H * H + 2 * 2 * 4 * 8 * max(H, 128)
    avail = max(budget - fixed, 0)

    per_batch = (
        2 * in_itemsize * S * (H + D)      # double-buffered h and l blocks
        + 2 * out_itemsize * (S + D)       # double-buffered out / weight blocks
        + 4 * S * (H + D)                  # live f32 intermediates (tanh act, w*l)
        + 4 * 8 * S                        # small f32 score / softmax temps
    )
    tb = int(avail // max(per_batch, 1))
    if tb >= B:
        return B

    # Keep at least ~4 grid steps once B is large enough: balances v7x's two
    # TensorCores (dimension_semantics "parallel") and keeps the DMA pipeline
    # busy.
    if B >= 32:
        tb = min(tb, pl.cdiv(B, 4))

    # Sublane constraint: the leading block dim must be a multiple of 8
    # (or equal B).
    tb = max(8, (tb // 8) * 8)
    return B if tb >= B else int(tb)


def attention_forward(h, l, w_weight, w_bias, v_weight, v_bias=None):
    """Parameter plumbing in plain JAX, compute in the Pallas kernel.

    h:        (B, S, H)
    l:        (B, S, D)
    w_weight: (H, H)   PyTorch nn.Linear weight (out_features, in_features)
    w_bias:   (H,)
    v_weight: (1, H)
    v_bias:   (1,)     accepted for API parity but unused: softmax over S is
                       shift-invariant, so both outputs are unchanged.
    """
    B, S, H = h.shape
    D = l.shape[2]

    # Stream h / l / W^T in their native dtype (no wrapper-side f32 upcast).
    stream_dtype = h.dtype
    h2 = h.reshape(B * S, H)                         # free wrapper-side reshape
    ww_t = w_weight.T.astype(stream_dtype)           # (H, H); y = x @ ww_t
    bw = w_bias.reshape(1, H).astype(jnp.float32)    # tiny resident params: f32
    wv_row = v_weight.reshape(1, H).astype(jnp.float32)
    # TODO(synk): expose the raw pre-softmax score if a caller ever needs it
    # (v_bias matters only for that, not for the two returned outputs).

    out_dtype = l.dtype
    w1_dtype = jnp.float32

    vmem_cap = _vmem_capacity_bytes()
    TB = _choose_batch_tile(
        B, S, H, D,
        in_itemsize=max(h.dtype.itemsize, l.dtype.itemsize),
        out_itemsize=max(jnp.dtype(out_dtype).itemsize, 4),
        param_itemsize=jnp.dtype(stream_dtype).itemsize,
        vmem_capacity=vmem_cap)
    grid = (pl.cdiv(B, TB),)

    out, weight1 = pl.pallas_call(
        attention_kernel,
        out_shape=(
            jax.ShapeDtypeStruct((B, D), out_dtype),
            jax.ShapeDtypeStruct((B, S), w1_dtype),
        ),
        grid=grid,
        in_specs=[
            pl.BlockSpec((TB * S, H), lambda i: (i, 0)),      # h rows, batch-tiled
            pl.BlockSpec((TB, S, D), lambda i: (i, 0, 0)),    # l, batch-tiled
            pl.BlockSpec((H, H), lambda i: (0, 0)),           # resident weights
            pl.BlockSpec((1, H), lambda i: (0, 0)),
            pl.BlockSpec((1, H), lambda i: (0, 0)),
        ],
        out_specs=(
            pl.BlockSpec((TB, D), lambda i: (i, 0)),
            pl.BlockSpec((TB, S), lambda i: (i, 0)),
        ),
        compiler_params=pltpu.CompilerParams(
            dimension_semantics=("parallel",),                # megacore sharding
            vmem_limit_bytes=min(int(0.90 * vmem_cap), 120 * 1024 * 1024),
        ),
    )(h2, l, ww_t, bw, wv_row)
    return out, weight1


def attention_reference(h, l, w_weight, w_bias, v_weight, v_bias):
    """Pure-JAX reference mirroring the PyTorch module."""
    wt = jnp.tanh(h @ w_weight.T + w_bias)          # (B, S, H)
    score = (wt @ v_weight.T + v_bias)[..., 0]      # (B, S)
    weight = jax.nn.softmax(score, axis=1)          # (B, S)
    out = jnp.sum(l * weight[..., None], axis=1)    # (B, D)
    return out, weight


if __name__ == "__main__":
    B, S, H, D = 2, 8, 32, 32

    key = jax.random.PRNGKey(0)
    k_h, k_l, k_ww, k_bw, k_wv, k_bv = jax.random.split(key, 6)

    h = jax.random.normal(k_h, (B, S, H), dtype=jnp.float32)
    l = jax.random.normal(k_l, (B, S, D), dtype=jnp.float32)

    # Deterministic parameter init (uniform +-1/sqrt(fan_in), like nn.Linear).
    bound = 1.0 / jnp.sqrt(jnp.float32(H))
    w_weight = jax.random.uniform(k_ww, (H, H), jnp.float32, -bound, bound)
    w_bias = jax.random.uniform(k_bw, (H,), jnp.float32, -bound, bound)
    v_weight = jax.random.uniform(k_wv, (1, H), jnp.float32, -bound, bound)
    v_bias = jax.random.uniform(k_bv, (1,), jnp.float32, -bound, bound)

    out, weight1 = attention_forward(h, l, w_weight, w_bias, v_weight, v_bias)
    jax.block_until_ready((out, weight1))

    out_ref, weight_ref = attention_reference(h, l, w_weight, w_bias,
                                              v_weight, v_bias)
    assert jnp.allclose(out, out_ref, atol=1e-5, rtol=1e-5)
    assert jnp.allclose(weight1, weight_ref, atol=1e-5, rtol=1e-5)

    print("KERNEL_OK")
</pallas_src>

<mosaic_0001>
module attributes {stable_mosaic.version = 11 : i64} {
  func.func @attention_kernel(%arg0: i32, %arg1: memref<16x32xf32, #tpu.memory_space<vmem>>, %arg2: memref<2x8x32xf32, #tpu.memory_space<vmem>>, %arg3: memref<32x32xf32, #tpu.memory_space<vmem>>, %arg4: memref<1x32xf32, #tpu.memory_space<vmem>>, %arg5: memref<1x32xf32, #tpu.memory_space<vmem>>, %arg6: memref<2x32xf32, #tpu.memory_space<vmem>>, %arg7: memref<2x8xf32, #tpu.memory_space<vmem>>) attributes {dimension_semantics = [#tpu.dimension_semantics<parallel>], iteration_bounds = array<i64: 1>, scalar_prefetch = 0 : i64, scratch_operands = 0 : i64, tpu.core_type = #tpu.core_type<tc>, window_params = [{transform_indices = @transform_0, window_bounds = array<i64: 16, 32>}, {transform_indices = @transform_1, window_bounds = array<i64: 2, 8, 32>}, {pipeline_mode = #tpu.pipeline_mode<synchronous>, transform_indices = @transform_2, window_bounds = array<i64: 32, 32>}, {pipeline_mode = #tpu.pipeline_mode<synchronous>, transform_indices = @transform_3, window_bounds = array<i64: 1, 32>}, {pipeline_mode = #tpu.pipeline_mode<synchronous>, transform_indices = @transform_4, window_bounds = array<i64: 1, 32>}, {transform_indices = @transform_5, window_bounds = array<i64: 2, 32>}, {transform_indices = @transform_6, window_bounds = array<i64: 2, 8>}]} {
    %c0 = arith.constant 0 : index
    %c0_0 = arith.constant 0 : index
    %0 = vector.load %arg1[%c0, %c0_0] : memref<16x32xf32, #tpu.memory_space<vmem>>, vector<16x32xf32>
    %c0_1 = arith.constant 0 : index
    %c0_2 = arith.constant 0 : index
    %1 = vector.load %arg3[%c0_1, %c0_2] : memref<32x32xf32, #tpu.memory_space<vmem>>, vector<32x32xf32>
    %cst = arith.constant dense<0.000000e+00> : vector<16x32xf32>
    %2 = tpu.matmul %0, %1, %cst {dimension_numbers = #tpu.dot_dimension_numbers<[1], [0], [0], [1], [0, 0, 1, 1], [], []>} : vector<16x32xf32>, vector<32x32xf32>, vector<16x32xf32> -> vector<16x32xf32>
    %c0_3 = arith.constant 0 : index
    %c0_4 = arith.constant 0 : index
    %3 = vector.load %arg4[%c0_3, %c0_4] : memref<1x32xf32, #tpu.memory_space<vmem>>, vector<1x32xf32>
    %4 = vector.broadcast %3 : vector<1x32xf32> to vector<16x32xf32>
    %5 = arith.addf %2, %4 : vector<16x32xf32>
    %6 = math.tanh %5 : vector<16x32xf32>
    %c0_5 = arith.constant 0 : index
    %c0_6 = arith.constant 0 : index
    %7 = vector.load %arg5[%c0_5, %c0_6] : memref<1x32xf32, #tpu.memory_space<vmem>>, vector<1x32xf32>
    %8 = vector.broadcast %7 : vector<1x32xf32> to vector<16x32xf32>
    %9 = arith.mulf %6, %8 : vector<16x32xf32>
    %cst_7 = arith.constant dense<0.000000e+00> : vector<16xf32>
    %10 = vector.multi_reduction <add>, %9, %cst_7 [1] : vector<16x32xf32> to vector<16xf32>
    %11 = vector.shape_cast %10 : vector<16xf32> to vector<16x1xf32>
    %12 = vector.shape_cast %11 : vector<16x1xf32> to vector<2x8xf32>
    %cst_8 = arith.constant dense<0xFF800000> : vector<2xf32>
    %13 = vector.multi_reduction <maximumf>, %12, %cst_8 [1] : vector<2x8xf32> to vector<2xf32>
    %14 = vector.shape_cast %13 : vector<2xf32> to vector<2x1xf32>
    %15 = vector.broadcast %14 : vector<2x1xf32> to vector<2x8xf32>
    %16 = arith.subf %12, %15 : vector<2x8xf32>
    %17 = math.exp %16 : vector<2x8xf32>
    %cst_9 = arith.constant dense<0.000000e+00> : vector<2xf32>
    %18 = vector.multi_reduction <add>, %17, %cst_9 [1] : vector<2x8xf32> to vector<2xf32>
    %19 = vector.shape_cast %18 : vector<2xf32> to vector<2x1xf32>
    %20 = tpu.reciprocal %19 : vector<2x1xf32> -> vector<2x1xf32>
    %21 = vector.broadcast %20 : vector<2x1xf32> to vector<2x8xf32>
    %22 = arith.mulf %17, %21 : vector<2x8xf32>
    %c0_10 = arith.constant 0 : index
    %c0_11 = arith.constant 0 : index
    %23 = vector.load %arg7[%c0_10, %c0_11] : memref<2x8xf32, #tpu.memory_space<vmem>>, vector<2x8xf32>
    tpu.vector_store %arg7[%c0_10, %c0_11], %22 {strides = array<i32>} : memref<2x8xf32, #tpu.memory_space<vmem>>, vector<2x8xf32>,
    %c0_12 = arith.constant 0 : index
    %c0_13 = arith.constant 0 : index
    %c0_14 = arith.constant 0 : index
    %24 = vector.load %arg2[%c0_12, %c0_13, %c0_14] : memref<2x8x32xf32, #tpu.memory_space<vmem>>, vector<2x8x32xf32>
    %25 = vector.shape_cast %22 : vector<2x8xf32> to vector<2x8x1xf32>
    %26 = vector.broadcast %25 : vector<2x8x1xf32> to vector<2x8x32xf32>
    %27 = arith.mulf %24, %26 : vector<2x8x32xf32>
    %cst_15 = arith.constant dense<0.000000e+00> : vector<2x32xf32>
    %28 = vector.multi_reduction <add>, %27, %cst_15 [1] : vector<2x8x32xf32> to vector<2x32xf32>
    %c0_16 = arith.constant 0 : index
    %c0_17 = arith.constant 0 : index
    %29 = vector.load %arg6[%c0_16, %c0_17] : memref<2x32xf32, #tpu.memory_space<vmem>>, vector<2x32xf32>
    tpu.vector_store %arg6[%c0_16, %c0_17], %28 {strides = array<i32>} : memref<2x32xf32, #tpu.memory_space<vmem>>, vector<2x32xf32>,
    return
  }
  func.func @transform_0(%arg0: i32) -> (i32, i32) {
    %c0_i32 = arith.constant 0 : i32
    %c0_i32_0 = arith.constant 0 : i32
    return %arg0, %c0_i32 : i32, i32
  }
  func.func @transform_1(%arg0: i32) -> (i32, i32, i32) {
    %c0_i32 = arith.constant 0 : i32
    %c0_i32_0 = arith.constant 0 : i32
    %c0_i32_1 = arith.constant 0 : i32
    return %arg0, %c0_i32, %c0_i32_0 : i32, i32, i32
  }
  func.func @transform_2(%arg0: i32) -> (i32, i32) {
    %c0_i32 = arith.constant 0 : i32
    %c0_i32_0 = arith.constant 0 : i32
    %c0_i32_1 = arith.constant 0 : i32
    return %c0_i32, %c0_i32_0 : i32, i32
  }
  func.func @transform_3(%arg0: i32) -> (i32, i32) {
    %c0_i32 = arith.constant 0 : i32
    %c0_i32_0 = arith.constant 0 : i32
    %c0_i32_1 = arith.constant 0 : i32
    return %c0_i32, %c0_i32_0 : i32, i32
  }
  func.func @transform_4(%arg0: i32) -> (i32, i32) {
    %c0_i32 = arith.constant 0 : i32
    %c0_i32_0 = arith.constant 0 : i32
    %c0_i32_1 = arith.constant 0 : i32
    return %c0_i32, %c0_i32_0 : i32, i32
  }
  func.func @transform_5(%arg0: i32) -> (i32, i32) {
    %c0_i32 = arith.constant 0 : i32
    %c0_i32_0 = arith.constant 0 : i32
    return %arg0, %c0_i32 : i32, i32
  }
  func.func @transform_6(%arg0: i32) -> (i32, i32) {
    %c0_i32 = arith.constant 0 : i32
    %c0_i32_0 = arith.constant 0 : i32
    return %arg0, %c0_i32 : i32, i32
  }
}

</mosaic_0001>

<bundles_post_ra>
// kernel: tpu_custom_call.1
= control target key start
LH: loop header
LB: loop body
LE: loop exit
PB: predicated region body
PF: predicated region fallthrough
CT: control target
= control target key end

     0   :  { %12 = vsyncpa [#allocation3], 0  ;;  %s500_s0 = inlined_call_operand.hbm [shape: f32[16,32], index: 0, kind: input, shape index: {}]   ;;  %s501_s1 = inlined_call_operand.hbm [shape: f32[2,8,32], index: 1, kind: input, shape index: {}]   ;;  %s502_s2 = inlined_call_operand.hbm [shape: f32[32,32], index: 2, kind: input, shape index: {}]   ;;  %s503_s3 = inlined_call_operand.vmem [shape: f32[1,32], index: 3, kind: input, shape index: {}]   ;;  %s504_s4 = inlined_call_operand.vmem [shape: f32[1,32], index: 4, kind: input, shape index: {}]   ;;  %s505_s5 = inlined_call_operand.hbm [shape: f32[2,32], index: 5, kind: output, shape index: {0}]   ;;  %s506_s6 = inlined_call_operand.hbm [shape: f32[2,8], index: 6, kind: output, shape index: {1}]  }
   0x1   :  { %13 = vsyncpa [#allocation6], 0 }
   0x2   :  { %14 = vsyncpa [#allocation4], 0 }
   0x3   :  { %15 = vsyncpa [#allocation10], 0  ;;  %s33_s23 = sshll.u32 %s501_s1, 4  ;;  %s415_s24 = smov [#allocation5]   ;;  %s34_s23 = int_to_ptr.hbm [resolvable:$true] %s33_s23 }
   0x4   :  { %s35_s25 = sshll.u32 %s415_s24, 4  ;;  %s20_s28 = sshll.u32 %s500_s0, 4  ;;  %s36_s25 = int_to_ptr.vmem [resolvable:$true] %s35_s25  ;;  %s21_s28 = int_to_ptr.hbm [resolvable:$true] %s20_s28 }
   0x5   :  { %s416_s29 = smov 128   ;;  %s417_s30 = smov 8  }
   0x6   :  { %41 = dma.hbm_to_vmem [thread:$0]  %s34_s23, 256, %s36_s25, [#allocation6], %s416_s29, %s416_s29, %s417_s30  }
   0x7   :  { %s418_s7 = smov [#allocation2]   ;;  %s46_s11 = sshll.u32 %s502_s2, 4  ;;  %s47_s11 = int_to_ptr.hbm [resolvable:$true] %s46_s11 }
   0x8   :  { %s22_s8 = sshll.u32 %s418_s7, 4  ;;  %s419_s1 = smov [#allocation7]   ;;  %s23_s8 = int_to_ptr.vmem [resolvable:$true] %s22_s8 }
   0x9   :  { %28 = dma.hbm_to_vmem [thread:$0]  %s21_s28, 256, %s23_s8, [#allocation3], %s416_s29, %s416_s29, %s417_s30  }
   0xa   :  { %s48_s12 = sshll.u32 %s419_s1, 4  ;;  %s49_s12 = int_to_ptr.vmem [resolvable:$true] %s48_s12 }
   0xb   :  { %54 = dma.hbm_to_vmem [thread:$0]  %s47_s11, 512, %s49_s12, [#allocation6], %s416_s29, %s416_s29, %s417_s30  }
   0xc   :  { %407 = dma.done.wait [#allocation3], 256  }
   0xd   :  { %408 = vsyncadd [#allocation3], 4294967040 }
   0xe   :  { %409 = dma.done.wait [#allocation6], 768  }
   0xf   :  { %410 = vsyncadd [#allocation6], 4294966528  ;;  %v76_v0 = vld [vmem:[#allocation7 + $0x18] sm:$0xff]  ;;  %v75_v1 = vld [vmem:[#allocation7 + $0x10] sm:$0xff]  ;;  %vm81_vm0 = vcmask 261120   ;;  %v127_v19 = vlaneseq  ;;  %vm131_vm1 = vcmask 1041409  }
  0x10   :  { %100 = vmatpush.msra.mxu0 %v76_v0  ;;  %260 = vmatpush.msra.mxu1 %v76_v0  ;;  %v74_v2 = vld [vmem:[#allocation7 + $0x8] sm:$0xff]  ;;  %v73_v3 = vld [vmem:[#allocation7] sm:$0xff]  ;;  %vm134_vm2 = vcmask 58368   ;;  %v420_v26 = vmov 0   ;;  %v199_v57 = vld [vmem:[#allocation5 + $0x8] sm:$0xff]  ;;  %s242_s17 = sshll.u32 %s506_s6, 4  ;;  %s243_s17 = int_to_ptr.hbm [resolvable:$true] %s242_s17 }
  0x11   :  { %v71_v4 = vld [vmem:[#allocation2] sm:$0xff]  ;;  %v72_v5 = vld [vmem:[#allocation2 + $0x8] sm:$0xff]  ;;  %v477_v20 = vand.u32 127, %v127_v19  ;;  %273 = vset.pattern.permute.xlu2 %v420_v26  ;;  %272 = vset.pattern.permute.xlu1 %v420_v26  ;;  %v198_v58 = vld [vmem:[#allocation5] sm:$0xff]  ;;  %s422_s6 = smov [#allocation8]   ;;  %s231_s21 = sshll.u32 %s505_s5, 4  ;;  %s232_s21 = int_to_ptr.hbm [resolvable:$true] %s231_s21 }
  0x12   :  { %101 = vmatpush.msra.mxu0 %v75_v1  ;;  %261 = vmatpush.msra.mxu1 %v75_v1  ;;  %v275_v6 = vld [vmem:[%s503_s3] ss:$0 sm:$0xff]  ;;  %s421_s3 = smov [#allocation9]   ;;  %s229_s18 = sshll.u32 %s422_s6, 4  ;;  %vm222_vm7 = vcmask 254976   ;;  %s230_s18 = int_to_ptr.vmem [resolvable:$true] %s229_s18 }
  0x13   :  { %v276_v11 = vld [vmem:[%s504_s4] ss:$0 sm:$0xff]  ;;  %274 = vset.pattern.permute.xlu0 %v420_v26  ;;  %s240_s4 = sshll.u32 %s421_s3, 4  ;;  %s241_s4 = int_to_ptr.vmem [resolvable:$true] %s240_s4 }
  0x14   :  { %102 = vmatpush.msra.mxu0 %v74_v2  ;;  %262 = vmatpush.msra.mxu1 %v74_v2 }
  0x16   :  { %103 = vmatpush.msra.mxu0 %v73_v3  ;;  %263 = vmatpush.msra.mxu1 %v73_v3 }
  0x17   :  { %258 = vmatmul.msk.f32.vlgmr.msra.gmra.mxu0 %vm81_vm0, %v71_v4  ;;  %259 = vmatmul.msk.f32.vlgmr.msra.gmra.mxu1 %vm81_vm0, %v72_v5 }
  0x94   :  { %v105_v7 = vpop.f32.mrf.mxu0  ;;  %v108_v8 = vpop.f32.mrf.mxu1 }
  0x95   :  { %v106_v9 = vadd.f32 %v275_v6, %v105_v7  ;;  %v109_v10 = vadd.f32 %v275_v6, %v108_v8 }
  0x97   :  { %277 = vtanh.f32 %v106_v9 }
  0x98   :  { %279 = vtanh.f32 %v109_v10 }
  0x9d   :  { %v278_v12 = vpop.eup %277 }
  0x9e   :  { %v117_v13 = vmul.f32 %v278_v12, %v276_v11  ;;  %v280_v14 = vpop.eup %279 }
  0x9f   :  { %v118_v16 = vmul.f32 %v280_v14, %v276_v11 }
  0xa0   :  { %v119_v15 = vsel %vm81_vm0, %v117_v13, 0.0 }
  0xa1   :  { %120 = vadd.xlane.f32.xlu0 %v119_v15  ;;  %v122_v17 = vsel %vm81_vm0, %v118_v16, 0.0 }
  0xa9   :  { %123 = vadd.xlane.f32.xlu0 %v122_v17 }
 0x114   :  { %v121_v18 = vpop.xlane.xlu0 %120 }
 0x115   :  { %v129_v22 = vperm.slane %v121_v18, %v477_v20 }
 0x11c   :  { %v124_v21 = vpop.xlane.xlu0 %123 }
 0x11d   :  { %v130_v23 = vperm.slane %v124_v21, %v477_v20 }
 0x11f   :  { %v132_v24 = vsel %vm131_vm1, %v130_v23, %v129_v22 }
 0x120   :  { %v135_v25 = vsel %vm134_vm2, %v132_v24, -inf }
 0x121   :  { %136 = vmax.xlane.f32.xlu1 %v135_v25 }
 0x194   :  { %v137_v27 = vpop.xlane.xlu1 %136 }
 0x195   :  { %v139_v28 = vperm.slane %v137_v27, 0  ;;  %v140_v29 = vperm.slane %v137_v27, 1 }
 0x197   :  { %v143_v30 = vsub.f32 %v121_v18, %v139_v28  ;;  %v144_v31 = vsub.f32 %v124_v21, %v140_v29 }
 0x199   :  { %v145_v32 = vmul.f32 1.442695, %v143_v30  ;;  %v147_v33 = vmul.f32 1.442695, %v144_v31 }
 0x19b   :  { %281 = vpow2.f32 %v145_v32 }
 0x19c   :  { %283 = vpow2.f32 %v147_v33 }
 0x1a1   :  { %v282_v34 = vpop.eup %281 }
 0x1a2   :  { %v284_v35 = vpop.eup %283  ;;  %152 = vperm.xlu1 %272, %v282_v34  }
 0x1a3   :  { %155 = vperm.xlu2 %273, %v284_v35  }
 0x1fd   :  { %v156_v36 = vpop.permute.xlu2 %155 }
 0x1fe   :  { %v158_v38 = vperm.slane %v156_v36, %v477_v20 }
 0x214   :  { %v153_v37 = vpop.permute.xlu1 %152 }
 0x215   :  { %v157_v39 = vperm.slane %v153_v37, %v477_v20 }
 0x217   :  { %v159_v40 = vsel %vm131_vm1, %v158_v38, %v157_v39 }
 0x218   :  { %v161_v41 = vsel %vm134_vm2, %v159_v40, 0.0 }
 0x219   :  { %162 = vadd.xlane.f32.xlu2 %v161_v41 }
 0x28c   :  { %v163_v42 = vpop.xlane.xlu2 %162 }
 0x28d   :  { %285 = vrcp.f32 %v163_v42  ;;  %v175_v46 = vand.u32 2147483648, %v163_v42  ;;  %v173_v48 = vand.u32 2147483647, %v163_v42  ;;  %vm169_vm4 = vweird.f32 %v163_v42 }
 0x28f   :  { %v176_v50 = vor.u32 1.1754944e-38, %v175_v46  ;;  %vm174_vm6 = vcmp.eq.f32.partialorder %v173_v48, 8.507059e+37 }
 0x293   :  { %v286_v43 = vpop.eup %285 }
 0x294   :  { %v165_v44 = vmul.f32 %v286_v43, %v163_v42  ;;  %vm170_vm3 = vweird.f32 %v286_v43 }
 0x295   :  { %vm171_vm5 = vmor %vm169_vm4, %vm170_vm3 }
 0x296   :  { %v166_v45 = vsub.f32 1.0, %v165_v44 }
 0x298   :  { %v167_v47 = vmul.f32 %v286_v43, %v166_v45 }
 0x29a   :  { %v168_v49 = vadd.f32 %v286_v43, %v167_v47 }
 0x29c   :  { %v172_v51 = vsel %vm171_vm5, %v286_v43, %v168_v49 }
 0x29d   :  { %v177_v52 = vsel %vm174_vm6, %v176_v50, %v172_v51 }
 0x29e   :  { %v180_v53 = vperm.slane %v177_v52, 1  ;;  %v179_v54 = vperm.slane %v177_v52, 0 }
 0x2a0   :  { %v184_v55 = vmul.f32 %v284_v35, %v180_v53  ;;  %v183_v56 = vmul.f32 %v282_v34, %v179_v54 }
 0x2a2   :  { %191 = vperm.xlu1 %272, %v184_v55   ;;  %188 = vperm.xlu0 %274, %v183_v56  }
 0x314   :  { %v192_v59 = vpop.permute.xlu1 %191  ;;  %v189_v60 = vpop.permute.xlu0 %188 }
 0x315   :  { %v194_v61 = vperm.slane %v192_v59, %v477_v20  ;;  %v203_v62 = vmul.f32 %v199_v57, %v192_v59  ;;  %v193_v63 = vperm.slane %v189_v60, %v477_v20  ;;  %v202_v0 = vmul.f32 %v198_v58, %v189_v60 }
 0x317   :  { %v211_v1 = vsel %vm81_vm0, %v203_v62, 0.0  ;;  %v195_v2 = vsel %vm131_vm1, %v194_v61, %v193_v63  ;;  %v204_v3 = vsel %vm81_vm0, %v202_v0, 0.0 }
 0x318   :  { %v212_v4 = vrot.slane %v211_v1, 4  ;;  %v205_v5 = vrot.slane %v204_v3, 4  ;;  %197 = vst.msk [vmem:[#allocation9] sm:$0x3] %vm134_vm2, %v195_v2 }
 0x319   :  { %245 = dma.vmem_to_hbm [thread:$0]  %s241_s4, 32, %s243_s17, [#allocation10]  }
 0x31a   :  { %v213_v6 = vadd.f32 %v212_v4, %v211_v1  ;;  %v206_v7 = vadd.f32 %v205_v5, %v204_v3 }
 0x31c   :  { %v214_v8 = vrot.slane %v213_v6, 2  ;;  %v207_v9 = vrot.slane %v206_v7, 2 }
 0x31e   :  { %v215_v10 = vadd.f32 %v214_v8, %v213_v6  ;;  %v208_v11 = vadd.f32 %v207_v9, %v206_v7 }
 0x320   :  { %v216_v12 = vrot.slane %v215_v10, 1  ;;  %v209_v13 = vrot.slane %v208_v11, 1 }
 0x322   :  { %v217_v14 = vadd.f32 %v216_v12, %v215_v10  ;;  %v210_v15 = vadd.f32 %v209_v13, %v208_v11 }
 0x324   :  { %v220_v16 = vsel %vm131_vm1, %v217_v14, %v210_v15 }
 0x325   :  { %223 = vst.msk [vmem:[#allocation8] sm:$0x3] %vm222_vm7, %v220_v16 }
 0x326   :  { %234 = dma.vmem_to_hbm [thread:$0]  %s230_s18, 32, %s232_s21, [#allocation4]  }
 0x327   :  { %411 = dma.done.wait [#allocation4], 32  }
 0x328   :  { %412 = vsyncadd [#allocation4], 4294967264 }
 0x329   :  { %413 = dma.done.wait [#allocation10], 32  }
 0x32a   :  { %414 = vsyncadd [#allocation10], 4294967264 }
 0x32b   :  { %254 = vsyncpa [#allocation3], 1 }
 0x32c   :  { %255 = vsyncpa [#allocation6], 1 }
 0x32d   :  { %256 = vsyncpa [#allocation4], 1 }
 0x32e   :  { %257 = vsyncpa [#allocation10], 1 }

</bundles_post_ra>
